<compile_context>
chip_gen: v7x
topology: tpu7x:2x2x1
jax: 0.10.0
libtpu: 0.0.40
codegen_flags: <defaults>
</compile_context>

<pallas_src>
import functools

import jax
import jax.numpy as jnp
from jax import lax
from jax.experimental import pallas as pl
from jax.experimental.pallas import tpu as pltpu


def _multilinear_kernel(x_ref, w_ref, b_ref, o_ref, acc_ref):
    # x_ref:   (tm, tk)   row/column tile of the flattened input
    # w_ref:   (tn, tk)   weight tile in torch Linear layout (out, in)
    # b_ref:   (1,  tn)   bias tile
    # o_ref:   (tm, tn)   output tile
    # acc_ref: (tm, tn)   f32 accumulator (persists across the K grid axis)
    @pl.when(pl.program_id(2) == 0)
    def _():
        acc_ref[...] = jnp.zeros_like(acc_ref)

    # x @ W^T on the MXU: contract axis 1 of x with axis 1 of W (no transpose
    # of W is ever materialized).
    acc_ref[...] += lax.dot_general(
        x_ref[...],
        w_ref[...],
        dimension_numbers=(((1,), (1,)), ((), ())),
        preferred_element_type=jnp.float32,
    )

    @pl.when(pl.program_id(2) == pl.num_programs(2) - 1)
    def _():
        o_ref[...] = (acc_ref[...] + b_ref[...].astype(jnp.float32)).astype(
            o_ref.dtype
        )


def _pick_k_tile(k, max_tile):
    """K tile must exactly divide K (ragged K would corrupt the accumulator)."""
    if k <= max_tile:
        return k
    for cand in (2048, 1024, 512, 256, 128):
        if cand <= max_tile and k % cand == 0:
            return cand
    # No aligned divisor: keep K un-tiled (correct, just more VMEM).
    return k


def multilinear_ode_forward(
    t, x, weight, bias, in_dims, out_dims, *, tile_m=256, tile_n=512, tile_k=2048
):
    """Pallas implementation of MultiLinearODE.forward.

    weight: (out_features, in_features)  -- same layout as torch.nn.Linear
    bias:   (out_features,) or None
    """
    del t  # unused, exactly like the PyTorch module

    in_features = functools.reduce(lambda a, b: a * b, in_dims)
    out_features = functools.reduce(lambda a, b: a * b, out_dims)

    batch_shape = x.shape[: x.ndim - len(in_dims)]
    m = 1
    for d in batch_shape:
        m *= d

    x2d = x.reshape(m, in_features)  # glue (view-level reshape)
    if bias is None:
        bias = jnp.zeros((out_features,), dtype=weight.dtype)
    b2d = bias.reshape(1, out_features)  # (1, N) glue

    # Tile selection.  Block dims must be (8,128)-aligned or equal the full
    # array dim; ragged edge blocks along M/N are masked by Pallas.
    tm = m if m <= tile_m else tile_m                      # tile_m multiple of 8/16
    tn = out_features if out_features <= tile_n else tile_n  # tile_n multiple of 128
    tk = _pick_k_tile(in_features, tile_k)

    grid = (pl.cdiv(m, tm), pl.cdiv(out_features, tn), in_features // tk)

    # Explicit VMEM budget for the chosen tiles (double-buffered inputs/outputs
    # + f32 accumulator), with headroom; capped at 64 MiB so it also fits v7x.
    x_bytes = jnp.dtype(x.dtype).itemsize
    w_bytes = jnp.dtype(weight.dtype).itemsize
    o_bytes = x_bytes
    working_set = (
        2 * tm * tk * x_bytes      # x tile, double-buffered
        + 2 * tn * tk * w_bytes    # weight tile, double-buffered
        + 2 * tn * w_bytes         # bias tile
        + 2 * tm * tn * o_bytes    # output tile
        + tm * tn * 4              # f32 accumulator scratch
    )
    vmem_limit = int(
        min(64 * 1024 * 1024, max(16 * 1024 * 1024, int(working_set * 1.5)))
    )

    cost = pl.CostEstimate(
        flops=2 * m * in_features * out_features,
        transcendentals=0,
        bytes_accessed=(
            m * in_features * x_bytes
            + out_features * in_features * w_bytes
            + out_features * w_bytes
            + m * out_features * o_bytes
        ),
    )

    out2d = pl.pallas_call(
        _multilinear_kernel,
        out_shape=jax.ShapeDtypeStruct((m, out_features), x.dtype),
        grid_spec=pltpu.PrefetchScalarGridSpec(
            num_scalar_prefetch=0,
            grid=grid,
            in_specs=[
                pl.BlockSpec((tm, tk), lambda i, j, k: (i, k)),   # x rows
                pl.BlockSpec((tn, tk), lambda i, j, k: (j, k)),   # W (N, K) tile
                pl.BlockSpec((1, tn), lambda i, j, k: (0, j)),    # bias
            ],
            out_specs=pl.BlockSpec((tm, tn), lambda i, j, k: (i, j)),
            scratch_shapes=[pltpu.VMEM((tm, tn), jnp.float32)],
        ),
        compiler_params=pltpu.CompilerParams(
            dimension_semantics=("parallel", "parallel", "arbitrary"),
            vmem_limit_bytes=vmem_limit,
        ),
        cost_estimate=cost,
    )(x2d, weight, b2d)

    return out2d.reshape(batch_shape + tuple(out_dims))


def init_multilinear_params(key, in_dims, out_dims, dtype=jnp.float32):
    """Deterministic init matching torch.nn.Linear shapes (synthetic weights)."""
    in_features = functools.reduce(lambda a, b: a * b, in_dims)
    out_features = functools.reduce(lambda a, b: a * b, out_dims)
    kw, kb = jax.random.split(key)
    bound = 1.0 / (in_features ** 0.5)
    weight = jax.random.uniform(
        kw, (out_features, in_features), dtype, minval=-bound, maxval=bound
    )
    bias = jax.random.uniform(
        kb, (out_features,), dtype, minval=-bound, maxval=bound
    )
    return weight, bias


def _reference(x, weight, bias, batch_shape, out_dims):
    x_flat = x.reshape(batch_shape + (-1,))
    return (x_flat @ weight.T + bias).reshape(batch_shape + tuple(out_dims))


if __name__ == "__main__":
    key = jax.random.PRNGKey(0)
    k_x, k_p, k_x2 = jax.random.split(key, 3)

    # --- small demo shapes consistent with the module ---
    in_dims = (4, 8)     # in_features  = 32
    out_dims = (2, 16)   # out_features = 32
    batch_shape = (2, 8)

    weight, bias = init_multilinear_params(k_p, in_dims, out_dims)

    x = jax.random.normal(k_x, batch_shape + in_dims, dtype=jnp.float32)
    t = jnp.float32(0.5)  # ignored by the forward, as in MultiLinearODE

    out = multilinear_ode_forward(t, x, weight, bias, in_dims, out_dims)
    out = jax.block_until_ready(out)
    ref = _reference(x, weight, bias, batch_shape, out_dims)
    assert out.shape == batch_shape + tuple(out_dims)
    assert jnp.allclose(out, ref, atol=1e-5, rtol=1e-5)

    # --- second check: M > tile_m with a ragged tail (exercises M tiling) ---
    batch_shape2 = (3, 128)  # M = 384 = 256 + ragged 128
    x2 = jax.random.normal(k_x2, batch_shape2 + in_dims, dtype=jnp.float32)
    out2 = multilinear_ode_forward(t, x2, weight, bias, in_dims, out_dims)
    out2 = jax.block_until_ready(out2)
    ref2 = _reference(x2, weight, bias, batch_shape2, out_dims)
    assert out2.shape == batch_shape2 + tuple(out_dims)
    assert jnp.allclose(out2, ref2, atol=1e-5, rtol=1e-5)

    print("KERNEL_OK")
</pallas_src>

<mosaic_0001>
module attributes {stable_mosaic.version = 11 : i64} {
  func.func @_multilinear_kernel(%arg0: i32, %arg1: i32, %arg2: i32, %arg3: memref<16x32xf32, #tpu.memory_space<vmem>>, %arg4: memref<32x32xf32, #tpu.memory_space<vmem>>, %arg5: memref<1x32xf32, #tpu.memory_space<vmem>>, %arg6: memref<16x32xf32, #tpu.memory_space<vmem>>, %arg7: memref<16x32xf32, #tpu.memory_space<vmem>>) attributes {dimension_semantics = [#tpu.dimension_semantics<parallel>, #tpu.dimension_semantics<parallel>, #tpu.dimension_semantics<arbitrary>], iteration_bounds = array<i64: 1, 1, 1>, scalar_prefetch = 0 : i64, scratch_operands = 1 : i64, tpu.core_type = #tpu.core_type<tc>, window_params = [{transform_indices = @transform_0, window_bounds = array<i64: 16, 32>}, {transform_indices = @transform_1, window_bounds = array<i64: 32, 32>}, {transform_indices = @transform_2, window_bounds = array<i64: 1, 32>}, {transform_indices = @transform_3, window_bounds = array<i64: 16, 32>}]} {
    %c0_i32 = arith.constant 0 : i32
    %0 = arith.cmpi eq, %arg2, %c0_i32 : i32
    %1 = arith.extui %0 : i1 to i32
    %c0_i32_0 = arith.constant 0 : i32
    %2 = arith.cmpi ne, %1, %c0_i32_0 : i32
    scf.if %2 {
      %cst_10 = arith.constant 0.000000e+00 : f32
      %12 = vector.broadcast %cst_10 : f32 to vector<16x32xf32>
      %c0_11 = arith.constant 0 : index
      %c0_12 = arith.constant 0 : index
      %13 = vector.load %arg7[%c0_11, %c0_12] : memref<16x32xf32, #tpu.memory_space<vmem>>, vector<16x32xf32>
      tpu.vector_store %arg7[%c0_11, %c0_12], %12 {strides = array<i32>} : memref<16x32xf32, #tpu.memory_space<vmem>>, vector<16x32xf32>,
    } else {
    }
    %c0 = arith.constant 0 : index
    %c0_1 = arith.constant 0 : index
    %3 = vector.load %arg7[%c0, %c0_1] : memref<16x32xf32, #tpu.memory_space<vmem>>, vector<16x32xf32>
    %c0_2 = arith.constant 0 : index
    %c0_3 = arith.constant 0 : index
    %4 = vector.load %arg3[%c0_2, %c0_3] : memref<16x32xf32, #tpu.memory_space<vmem>>, vector<16x32xf32>
    %c0_4 = arith.constant 0 : index
    %c0_5 = arith.constant 0 : index
    %5 = vector.load %arg4[%c0_4, %c0_5] : memref<32x32xf32, #tpu.memory_space<vmem>>, vector<32x32xf32>
    %cst = arith.constant dense<0.000000e+00> : vector<16x32xf32>
    %6 = tpu.matmul %4, %5, %cst {dimension_numbers = #tpu.dot_dimension_numbers<[1], [1], [0], [0], [0, 0, 1, 0], [], []>} : vector<16x32xf32>, vector<32x32xf32>, vector<16x32xf32> -> vector<16x32xf32>
    %7 = arith.addf %3, %6 : vector<16x32xf32>
    %c0_6 = arith.constant 0 : index
    %c0_7 = arith.constant 0 : index
    %8 = vector.load %arg7[%c0_6, %c0_7] : memref<16x32xf32, #tpu.memory_space<vmem>>, vector<16x32xf32>
    tpu.vector_store %arg7[%c0_6, %c0_7], %7 {strides = array<i32>} : memref<16x32xf32, #tpu.memory_space<vmem>>, vector<16x32xf32>,
    %c0_i32_8 = arith.constant 0 : i32
    %9 = arith.cmpi eq, %arg2, %c0_i32_8 : i32
    %10 = arith.extui %9 : i1 to i32
    %c0_i32_9 = arith.constant 0 : i32
    %11 = arith.cmpi ne, %10, %c0_i32_9 : i32
    scf.if %11 {
      %c0_10 = arith.constant 0 : index
      %c0_11 = arith.constant 0 : index
      %12 = vector.load %arg7[%c0_10, %c0_11] : memref<16x32xf32, #tpu.memory_space<vmem>>, vector<16x32xf32>
      %c0_12 = arith.constant 0 : index
      %c0_13 = arith.constant 0 : index
      %13 = vector.load %arg5[%c0_12, %c0_13] : memref<1x32xf32, #tpu.memory_space<vmem>>, vector<1x32xf32>
      %14 = vector.broadcast %13 : vector<1x32xf32> to vector<16x32xf32>
      %15 = arith.addf %12, %14 : vector<16x32xf32>
      %c0_14 = arith.constant 0 : index
      %c0_15 = arith.constant 0 : index
      %16 = vector.load %arg6[%c0_14, %c0_15] : memref<16x32xf32, #tpu.memory_space<vmem>>, vector<16x32xf32>
      tpu.vector_store %arg6[%c0_14, %c0_15], %15 {strides = array<i32>} : memref<16x32xf32, #tpu.memory_space<vmem>>, vector<16x32xf32>,
    } else {
    }
    return
  }
  func.func @transform_0(%arg0: i32, %arg1: i32, %arg2: i32) -> (i32, i32) {
    %c0_i32 = arith.constant 0 : i32
    return %arg0, %arg2 : i32, i32
  }
  func.func @transform_1(%arg0: i32, %arg1: i32, %arg2: i32) -> (i32, i32) {
    %c0_i32 = arith.constant 0 : i32
    return %arg1, %arg2 : i32, i32
  }
  func.func @transform_2(%arg0: i32, %arg1: i32, %arg2: i32) -> (i32, i32) {
    %c0_i32 = arith.constant 0 : i32
    %c0_i32_0 = arith.constant 0 : i32
    return %c0_i32, %arg1 : i32, i32
  }
  func.func @transform_3(%arg0: i32, %arg1: i32, %arg2: i32) -> (i32, i32) {
    %c0_i32 = arith.constant 0 : i32
    return %arg0, %arg1 : i32, i32
  }
}

</mosaic_0001>

<bundles_post_ra>
// kernel: tpu_custom_call.1
= control target key start
LH: loop header
LB: loop body
LE: loop exit
PB: predicated region body
PF: predicated region fallthrough
CT: control target
= control target key end

     0   :  { %8 = vsyncpa [#allocation4], 0  ;;  %s388_s0 = inlined_call_operand.hbm [shape: f32[16,32], index: 0, kind: input, shape index: {}]   ;;  %s389_s1 = inlined_call_operand.hbm [shape: f32[32,32], index: 1, kind: input, shape index: {}]   ;;  %s390_s2 = inlined_call_operand.vmem [shape: f32[1,32], index: 2, kind: input, shape index: {}]   ;;  %s391_s3 = inlined_call_operand.hbm [shape: f32[16,32], index: 3, kind: output, shape index: {}]  }
   0x1   :  { %9 = vsyncpa [#allocation7], 0 }
   0x2   :  { %10 = vsyncpa [#allocation5], 0  ;;  %s304_s12 = smov [#allocation3]   ;;  %s232_s16 = scalar_lea.hbm %s388_s0, 256 }
   0x3   :  { %s16_s13 = sshll.u32 %s304_s12, 4  ;;  %p233_p0 = scmp.ne.s32.totalorder %s388_s0, %s232_s16  ;;  %s17_s13 = int_to_ptr.vmem [resolvable:$true] %s16_s13 }
   0x4   :  { %p236_p1 = scmp.lt.u32.totalorder %s232_s16, %s388_s0 }
   0x6   :  { %p238_p2 = pnand %p236_p1, %p233_p0 }
   0x8   :  { %241 = shalt.err (!%p238_p2)
}
   0x9   :  { %s242_s21 = scalar_lea.vmem %s17_s13, 256  ;;  %p247_p4 = scmp.lt.s32.totalorder %s17_s13, %s17_s13 }
   0xa   :  { %p243_p3 = scmp.ne.s32.totalorder %s17_s13, %s242_s21  ;;  %p248_p5 = scmp.lt.s32.totalorder %s242_s21, %s242_s21 }
   0xc   :  { %p249_p6 = por %p248_p5, %p247_p4 }
   0xe   :  { %p250_p7 = pnand %p249_p6, %p243_p3 }
  0x10   :  { %253 = shalt.err (!%p250_p7)
}
  0x11   :  { %s305_s22 = smov 128   ;;  %s306_s23 = smov 8  }
  0x12   :  { %22 = dma.hbm_to_vmem [thread:$0]  %s388_s0, 256, %s17_s13, [#allocation4], %s305_s22, %s305_s22, %s306_s23  }
  0x13   :  { %s307_s26 = smov [#allocation6]   ;;  %s254_s30 = scalar_lea.hbm %s389_s1, 512 }
  0x14   :  { %s28_s27 = sshll.u32 %s307_s26, 4  ;;  %p255_p8 = scmp.ne.s32.totalorder %s389_s1, %s254_s30  ;;  %s29_s27 = int_to_ptr.vmem [resolvable:$true] %s28_s27 }
  0x15   :  { %p258_p9 = scmp.lt.u32.totalorder %s254_s30, %s389_s1 }
  0x17   :  { %p260_p10 = pnand %p258_p9, %p255_p8 }
  0x19   :  { %263 = shalt.err (!%p260_p10)
}
  0x1a   :  { %s264_s8 = scalar_lea.vmem %s29_s27, 512  ;;  %p269_p12 = scmp.lt.s32.totalorder %s29_s27, %s29_s27 }
  0x1b   :  { %p265_p11 = scmp.ne.s32.totalorder %s29_s27, %s264_s8  ;;  %p270_p13 = scmp.lt.s32.totalorder %s264_s8, %s264_s8 }
  0x1d   :  { %p271_p0 = por %p270_p13, %p269_p12 }
  0x1f   :  { %p272_p1 = pnand %p271_p0, %p265_p11 }
  0x21   :  { %275 = shalt.err (!%p272_p1)
}
  0x22   :  { %34 = dma.hbm_to_vmem [thread:$0]  %s389_s1, 512, %s29_s27, [#allocation7], %s305_s22, %s305_s22, %s306_s23  }
  0x23   :  { %298 = dma.done.wait [#allocation4], 256  }
  0x24   :  { %299 = vsyncadd [#allocation4], 4294967040 }
  0x25   :  { %300 = dma.done.wait [#allocation7], 512  }
  0x26   :  { %301 = vsyncadd [#allocation7], 4294966784  ;;  %vm47_vm0 = vcmask 261120   ;;  %v308_v0 = vmov 0.0   ;;  %v54_v1 = vld [vmem:[#allocation6] sm:$0xff]  ;;  %v55_v2 = vld [vmem:[#allocation6 + $0x8] sm:$0xff] }
  0x27   :  { %49 = vst.msk [vmem:[#allocation2 + $0x8] sm:$0xff] %vm47_vm0, %v308_v0  ;;  %48 = vst.msk [vmem:[#allocation2] sm:$0xff] %vm47_vm0, %v308_v0  ;;  %v56_v3 = vld [vmem:[#allocation6 + $0x10] sm:$0xff]  ;;  %v214_v4 = vpack.c.bf16 %v55_v2, %v54_v1  ;;  %v57_v5 = vld [vmem:[#allocation6 + $0x18] sm:$0xff]  ;;  %s309_s11 = smov [#allocation8]  }
  0x28   :  { %vm215_vm1 = vmpackc.low %vm47_vm0, %vm47_vm0  ;;  %v52_v6 = vld [vmem:[#allocation3] sm:$0xff]  ;;  %v220_v7 = vpack.c.bf16 %v57_v5, %v56_v3  ;;  %v53_v8 = vld [vmem:[#allocation3 + $0x8] sm:$0xff]  ;;  %s177_s12 = sshll.u32 %s309_s11, 4  ;;  %s178_s12 = int_to_ptr.vmem [resolvable:$true] %s177_s12 }
  0x29   :  { %211 = vmatprep.mubr.msk.f32.mxu0 %vm47_vm0, %v52_v6  ;;  %216 = vmatprep.subr.msk.bf16.mxu0 %vm215_vm1, %v214_v4  ;;  %v196_v15 = vld [vmem:[%s390_s2] ss:$0 sm:$0xff]  ;;  %s276_s13 = scalar_lea.vmem %s178_s12, 256  ;;  %p281_p3 = scmp.lt.s32.totalorder %s178_s12, %s178_s12 }
  0x2a   :  { %219 = vmatpush3.bf16.xpose.msk.msra.mxu0 %vm215_vm1, %v214_v4  ;;  %p277_p2 = scmp.ne.s32.totalorder %s178_s12, %s276_s13  ;;  %p282_p4 = scmp.lt.s32.totalorder %s276_s13, %s276_s13 }
  0x2b   :  { %222 = vmatprep.subr.msk.bf16.mxu0 %vm215_vm1, %v220_v7 }
  0x2c   :  { %p283_p5 = por %p282_p4, %p281_p3 }
  0x2e   :  { %v51_v9 = vld [vmem:[#allocation2 + $0x8] sm:$0xff]  ;;  %v50_v10 = vld [vmem:[#allocation2] sm:$0xff]  ;;  %p284_p6 = pnand %p283_p5, %p277_p2 }
  0x32   :  { %225 = vmatpush3.bf16.xpose.msk.msra.mxu0 %vm215_vm1, %v220_v7 }
  0x39   :  { %212 = vmatmul.mubr.msk.f32.vlgmr.msra.gmra.mrb[0].mxu0 %vm47_vm0, %v53_v8 }
 0x10c   :  { %v213_v11 = vpop.f32.mrb[0].mxu0 }
 0x10d   :  { %v153_v12 = vadd.f32 %v213_v11, %v51_v9  ;;  %v143_v13 = vpop.f32.mrb[1].mxu0 }
 0x10e   :  { %v152_v14 = vadd.f32 %v143_v13, %v50_v10 }
 0x10f   :  { %155 = vst.msk [vmem:[#allocation2 + $0x8] sm:$0xff] %vm47_vm0, %v153_v12 }
 0x110   :  { %154 = vst.msk [vmem:[#allocation2] sm:$0xff] %vm47_vm0, %v152_v14 }
 0x116   :  { %v160_v16 = vld [vmem:[#allocation2 + $0x8] sm:$0xff] }
 0x117   :  { %v159_v17 = vld [vmem:[#allocation2] sm:$0xff]  ;;  %v169_v18 = vadd.f32 %v196_v15, %v160_v16 }
 0x118   :  { %v168_v19 = vadd.f32 %v196_v15, %v159_v17 }
 0x119   :  { %171 = vst.msk [vmem:[#allocation8 + $0x8] sm:$0xff] %vm47_vm0, %v169_v18 }
 0x11a   :  { %170 = vst.msk [vmem:[#allocation8] sm:$0xff] %vm47_vm0, %v168_v19 }
 0x11b   :  { %287 = shalt.err (!%p284_p6)
}
 0x11c   :  { %s288_s15 = scalar_lea.hbm %s391_s3, 256 }
 0x11d   :  { %p289_p7 = scmp.ne.s32.totalorder %s391_s3, %s288_s15  ;;  %p292_p8 = scmp.lt.u32.totalorder %s288_s15, %s391_s3 }
 0x11f   :  { %p294_p9 = pnand %p292_p8, %p289_p7 }
 0x121   :  { %297 = shalt.err (!%p294_p9)
}
 0x122   :  { %183 = dma.vmem_to_hbm [thread:$0]  %s178_s12, 256, %s391_s3, [#allocation5], %s305_s22, %s305_s22, %s306_s23  }
 0x123   :  { %302 = dma.done.wait [#allocation5], 256  }
 0x124   :  { %303 = vsyncadd [#allocation5], 4294967040 }
 0x125   :  { %187 = vsyncpa [#allocation4], 1 }
 0x126   :  { %188 = vsyncpa [#allocation7], 1 }
 0x127   :  { %189 = vsyncpa [#allocation5], 1 }

</bundles_post_ra>
